<compile_context>
chip_gen: v7x
topology: tpu7x:2x2x1
jax: 0.10.0
libtpu: 0.0.40
codegen_flags: <defaults>
</compile_context>

<pallas_src>
import jax
import jax.numpy as jnp
from jax.experimental import pallas as pl
from jax.experimental.pallas import tpu as pltpu


def actor_kernel(xt_ref, w1_ref, b1_ref, w2_ref, b2_ref, w3_ref, b3_ref, out_ref):
    xt = xt_ref[...]                                                   # (F, tm), batch on lanes

    # fc1 + relu : (H, F) @ (F, tm) -> (H, tm)
    h1 = jnp.dot(w1_ref[...], xt, preferred_element_type=jnp.float32) + b1_ref[...]
    h1 = jnp.maximum(h1, 0.0)

    # fc2 + relu : (H, H) @ (H, tm) -> (H, tm)
    h2 = jnp.dot(w2_ref[...], h1, preferred_element_type=jnp.float32) + b2_ref[...]
    h2 = jnp.maximum(h2, 0.0)

    # fc3 (pre-sliced to the 2 used rows) + relu, +0.1 fused into the store.
    o = jnp.dot(w3_ref[...], h2, preferred_element_type=jnp.float32) + b3_ref[...]
    out_ref[...] = jnp.maximum(o, 0.0) + 0.1                           # (2, tm), lane-dense store


def _round_up(n, m):
    return ((n + m - 1) // m) * m


def actor_forward(x, params, *, block_cols=4096):
    """x: (B, num_inputs) float32.  Returns (dist_arg0, dist_arg1), each (B, 1)."""
    w1, b1, w2, b2, w3, b3 = params        # PyTorch layout: w (out, in), b (out,)
    B, F = x.shape
    H = w1.shape[0]

    # Batch on the lane axis.  (Callers that already hold features-major data can
    # feed (F, B) directly and skip this transpose.)
    xt = x.T

    # Only rows 0 and 1 of fc3 ever reach the outputs -> slice in the wrapper.
    w3s = w3[:2, :]
    b1c = b1.reshape(H, 1)
    b2c = b2.reshape(H, 1)
    b3c = b3[:2].reshape(2, 1)

    # Batch tile on the lane axis: full batch if tiny, otherwise a multiple of 128
    # sized so the parallel grid has >=2 steps (v7x has 2 TensorCores), capped at
    # block_cols (~1 MiB of activations at 4096 -- far below any gen's VMEM).
    if B <= 128:
        tm = B                                         # single full-array tile
    else:
        cap = max(128, (block_cols // 128) * 128)      # keep lane tiles 128-aligned
        tm = min(cap, _round_up(pl.cdiv(B, 2), 128))
    grid = (pl.cdiv(B, tm),)                           # ragged last tile handled by Pallas

    out = pl.pallas_call(
        actor_kernel,
        out_shape=jax.ShapeDtypeStruct((2, B), jnp.float32),
        grid_spec=pltpu.PrefetchScalarGridSpec(
            num_scalar_prefetch=0,
            grid=grid,
            in_specs=[
                pl.BlockSpec((F, tm), lambda i: (0, i)),       # x^T tiled over batch lanes
                # Constant-block-index weights/biases: fetched once, resident in VMEM.
                pl.BlockSpec(w1.shape, lambda i: (0, 0)),
                pl.BlockSpec(b1c.shape, lambda i: (0, 0)),
                pl.BlockSpec(w2.shape, lambda i: (0, 0)),
                pl.BlockSpec(b2c.shape, lambda i: (0, 0)),
                pl.BlockSpec(w3s.shape, lambda i: (0, 0)),
                pl.BlockSpec(b3c.shape, lambda i: (0, 0)),
            ],
            out_specs=pl.BlockSpec((2, tm), lambda i: (0, i)),  # single lane-dense output block
        ),
        compiler_params=pltpu.CompilerParams(
            dimension_semantics=("parallel",),                  # shard batch tiles across TCs (v7x)
        ),
    )(xt, w1, b1c, w2, b2c, w3s, b3c)

    # Split rows 0/1 and present them as (B, 1) like the PyTorch module.
    return out[0].reshape(B, 1), out[1].reshape(B, 1)


def init_linear(key, fan_in, fan_out):
    # PyTorch-style uniform(-1/sqrt(fan_in), 1/sqrt(fan_in)) init, PyTorch layout.
    kw, kb = jax.random.split(key)
    bound = 1.0 / jnp.sqrt(fan_in)
    w = jax.random.uniform(kw, (fan_out, fan_in), jnp.float32, -bound, bound)   # (out, in)
    b = jax.random.uniform(kb, (fan_out,), jnp.float32, -bound, bound)          # (out,)
    return w, b


def make_params(key, num_inputs, hidden_size, num_outputs):
    k1, k2, k3 = jax.random.split(key, 3)
    w1, b1 = init_linear(k1, num_inputs, hidden_size)
    w2, b2 = init_linear(k2, hidden_size, hidden_size)
    w3, b3 = init_linear(k3, hidden_size, num_outputs)
    return (w1, b1, w2, b2, w3, b3)


def actor_reference(x, params):
    w1, b1, w2, b2, w3, b3 = params
    h1 = jnp.maximum(x @ w1.T + b1, 0.0)
    h2 = jnp.maximum(h1 @ w2.T + b2, 0.0)
    out = jnp.maximum(h2 @ w3.T + b3, 0.0)
    return out[:, 0:1] + 0.1, out[:, 1:2] + 0.1


if __name__ == "__main__":
    B = 8            # batch
    NUM_INPUTS = 16  # observation dim
    HIDDEN = 32      # args.hidden_size
    NUM_OUTPUTS = 4  # action-dist parameter dim (>= 2; forward uses rows 0 and 1)

    key = jax.random.PRNGKey(0)
    kx, kp = jax.random.split(key)
    x = jax.random.normal(kx, (B, NUM_INPUTS), jnp.float32)
    params = make_params(kp, NUM_INPUTS, HIDDEN, NUM_OUTPUTS)

    # Single-tile path (grid of 1, full-array blocks).
    d0, d1 = actor_forward(x, params)
    jax.block_until_ready((d0, d1))
    r0, r1 = actor_reference(x, params)
    assert d0.shape == (B, 1) and d1.shape == (B, 1)
    assert jnp.allclose(d0, r0, atol=1e-5, rtol=1e-5), "dist_arg0 mismatch"
    assert jnp.allclose(d1, r1, atol=1e-5, rtol=1e-5), "dist_arg1 mismatch"

    # Multi-step batch grid + ragged last tile (B=300 with 128-lane tiles -> 3 steps).
    B2 = 300
    x2 = jax.random.normal(jax.random.PRNGKey(1), (B2, NUM_INPUTS), jnp.float32)
    g0, g1 = actor_forward(x2, params, block_cols=128)
    jax.block_until_ready((g0, g1))
    q0, q1 = actor_reference(x2, params)
    assert g0.shape == (B2, 1) and g1.shape == (B2, 1)
    assert jnp.allclose(g0, q0, atol=1e-5, rtol=1e-5), "gridded dist_arg0 mismatch"
    assert jnp.allclose(g1, q1, atol=1e-5, rtol=1e-5), "gridded dist_arg1 mismatch"

    print("KERNEL_OK")
</pallas_src>

<mosaic_0001>
module attributes {stable_mosaic.version = 11 : i64} {
  func.func @actor_kernel(%arg0: i32, %arg1: memref<16x8xf32, #tpu.memory_space<vmem>>, %arg2: memref<32x16xf32, #tpu.memory_space<vmem>>, %arg3: memref<32x1xf32, #tpu.memory_space<vmem>>, %arg4: memref<32x32xf32, #tpu.memory_space<vmem>>, %arg5: memref<32x1xf32, #tpu.memory_space<vmem>>, %arg6: memref<2x32xf32, #tpu.memory_space<vmem>>, %arg7: memref<2x1xf32, #tpu.memory_space<vmem>>, %arg8: memref<2x8xf32, #tpu.memory_space<vmem>>) attributes {dimension_semantics = [#tpu.dimension_semantics<parallel>], iteration_bounds = array<i64: 1>, scalar_prefetch = 0 : i64, scratch_operands = 0 : i64, tpu.core_type = #tpu.core_type<tc>, window_params = [{transform_indices = @transform_0, window_bounds = array<i64: 16, 8>}, {pipeline_mode = #tpu.pipeline_mode<synchronous>, transform_indices = @transform_1, window_bounds = array<i64: 32, 16>}, {pipeline_mode = #tpu.pipeline_mode<synchronous>, transform_indices = @transform_2, window_bounds = array<i64: 32, 1>}, {pipeline_mode = #tpu.pipeline_mode<synchronous>, transform_indices = @transform_3, window_bounds = array<i64: 32, 32>}, {pipeline_mode = #tpu.pipeline_mode<synchronous>, transform_indices = @transform_4, window_bounds = array<i64: 32, 1>}, {pipeline_mode = #tpu.pipeline_mode<synchronous>, transform_indices = @transform_5, window_bounds = array<i64: 2, 32>}, {pipeline_mode = #tpu.pipeline_mode<synchronous>, transform_indices = @transform_6, window_bounds = array<i64: 2, 1>}, {transform_indices = @transform_7, window_bounds = array<i64: 2, 8>}]} {
    %c0 = arith.constant 0 : index
    %c0_0 = arith.constant 0 : index
    %0 = vector.load %arg1[%c0, %c0_0] : memref<16x8xf32, #tpu.memory_space<vmem>>, vector<16x8xf32>
    %c0_1 = arith.constant 0 : index
    %c0_2 = arith.constant 0 : index
    %1 = vector.load %arg2[%c0_1, %c0_2] : memref<32x16xf32, #tpu.memory_space<vmem>>, vector<32x16xf32>
    %cst = arith.constant dense<0.000000e+00> : vector<32x8xf32>
    %2 = tpu.matmul %1, %0, %cst {dimension_numbers = #tpu.dot_dimension_numbers<[1], [0], [0], [1], [0, 0, 1, 1], [], []>} : vector<32x16xf32>, vector<16x8xf32>, vector<32x8xf32> -> vector<32x8xf32>
    %c0_3 = arith.constant 0 : index
    %c0_4 = arith.constant 0 : index
    %3 = vector.load %arg3[%c0_3, %c0_4] : memref<32x1xf32, #tpu.memory_space<vmem>>, vector<32x1xf32>
    %4 = vector.broadcast %3 : vector<32x1xf32> to vector<32x8xf32>
    %5 = arith.addf %2, %4 : vector<32x8xf32>
    %cst_5 = arith.constant 0.000000e+00 : f32
    %6 = vector.broadcast %cst_5 : f32 to vector<32x8xf32>
    %7 = arith.maximumf %5, %6 : vector<32x8xf32>
    %c0_6 = arith.constant 0 : index
    %c0_7 = arith.constant 0 : index
    %8 = vector.load %arg4[%c0_6, %c0_7] : memref<32x32xf32, #tpu.memory_space<vmem>>, vector<32x32xf32>
    %cst_8 = arith.constant dense<0.000000e+00> : vector<32x8xf32>
    %9 = tpu.matmul %8, %7, %cst_8 {dimension_numbers = #tpu.dot_dimension_numbers<[1], [0], [0], [1], [0, 0, 1, 1], [], []>} : vector<32x32xf32>, vector<32x8xf32>, vector<32x8xf32> -> vector<32x8xf32>
    %c0_9 = arith.constant 0 : index
    %c0_10 = arith.constant 0 : index
    %10 = vector.load %arg5[%c0_9, %c0_10] : memref<32x1xf32, #tpu.memory_space<vmem>>, vector<32x1xf32>
    %11 = vector.broadcast %10 : vector<32x1xf32> to vector<32x8xf32>
    %12 = arith.addf %9, %11 : vector<32x8xf32>
    %cst_11 = arith.constant 0.000000e+00 : f32
    %13 = vector.broadcast %cst_11 : f32 to vector<32x8xf32>
    %14 = arith.maximumf %12, %13 : vector<32x8xf32>
    %c0_12 = arith.constant 0 : index
    %c0_13 = arith.constant 0 : index
    %15 = vector.load %arg6[%c0_12, %c0_13] : memref<2x32xf32, #tpu.memory_space<vmem>>, vector<2x32xf32>
    %cst_14 = arith.constant dense<0.000000e+00> : vector<2x8xf32>
    %16 = tpu.matmul %15, %14, %cst_14 {dimension_numbers = #tpu.dot_dimension_numbers<[1], [0], [0], [1], [0, 0, 1, 1], [], []>} : vector<2x32xf32>, vector<32x8xf32>, vector<2x8xf32> -> vector<2x8xf32>
    %c0_15 = arith.constant 0 : index
    %c0_16 = arith.constant 0 : index
    %17 = vector.load %arg7[%c0_15, %c0_16] : memref<2x1xf32, #tpu.memory_space<vmem>>, vector<2x1xf32>
    %18 = vector.broadcast %17 : vector<2x1xf32> to vector<2x8xf32>
    %19 = arith.addf %16, %18 : vector<2x8xf32>
    %cst_17 = arith.constant 0.000000e+00 : f32
    %20 = vector.broadcast %cst_17 : f32 to vector<2x8xf32>
    %21 = arith.maximumf %19, %20 : vector<2x8xf32>
    %cst_18 = arith.constant 1.000000e-01 : f32
    %22 = vector.broadcast %cst_18 : f32 to vector<2x8xf32>
    %23 = arith.addf %21, %22 : vector<2x8xf32>
    %c0_19 = arith.constant 0 : index
    %c0_20 = arith.constant 0 : index
    %24 = vector.load %arg8[%c0_19, %c0_20] : memref<2x8xf32, #tpu.memory_space<vmem>>, vector<2x8xf32>
    tpu.vector_store %arg8[%c0_19, %c0_20], %23 {strides = array<i32>} : memref<2x8xf32, #tpu.memory_space<vmem>>, vector<2x8xf32>,
    return
  }
  func.func @transform_0(%arg0: i32) -> (i32, i32) {
    %c0_i32 = arith.constant 0 : i32
    %c0_i32_0 = arith.constant 0 : i32
    return %c0_i32, %arg0 : i32, i32
  }
  func.func @transform_1(%arg0: i32) -> (i32, i32) {
    %c0_i32 = arith.constant 0 : i32
    %c0_i32_0 = arith.constant 0 : i32
    %c0_i32_1 = arith.constant 0 : i32
    return %c0_i32, %c0_i32_0 : i32, i32
  }
  func.func @transform_2(%arg0: i32) -> (i32, i32) {
    %c0_i32 = arith.constant 0 : i32
    %c0_i32_0 = arith.constant 0 : i32
    %c0_i32_1 = arith.constant 0 : i32
    return %c0_i32, %c0_i32_0 : i32, i32
  }
  func.func @transform_3(%arg0: i32) -> (i32, i32) {
    %c0_i32 = arith.constant 0 : i32
    %c0_i32_0 = arith.constant 0 : i32
    %c0_i32_1 = arith.constant 0 : i32
    return %c0_i32, %c0_i32_0 : i32, i32
  }
  func.func @transform_4(%arg0: i32) -> (i32, i32) {
    %c0_i32 = arith.constant 0 : i32
    %c0_i32_0 = arith.constant 0 : i32
    %c0_i32_1 = arith.constant 0 : i32
    return %c0_i32, %c0_i32_0 : i32, i32
  }
  func.func @transform_5(%arg0: i32) -> (i32, i32) {
    %c0_i32 = arith.constant 0 : i32
    %c0_i32_0 = arith.constant 0 : i32
    %c0_i32_1 = arith.constant 0 : i32
    return %c0_i32, %c0_i32_0 : i32, i32
  }
  func.func @transform_6(%arg0: i32) -> (i32, i32) {
    %c0_i32 = arith.constant 0 : i32
    %c0_i32_0 = arith.constant 0 : i32
    %c0_i32_1 = arith.constant 0 : i32
    return %c0_i32, %c0_i32_0 : i32, i32
  }
  func.func @transform_7(%arg0: i32) -> (i32, i32) {
    %c0_i32 = arith.constant 0 : i32
    %c0_i32_0 = arith.constant 0 : i32
    return %c0_i32, %arg0 : i32, i32
  }
}

</mosaic_0001>

<bundles_post_ra>
// kernel: tpu_custom_call.1
= control target key start
LH: loop header
LB: loop body
LE: loop exit
PB: predicated region body
PF: predicated region fallthrough
CT: control target
= control target key end

     0   :  { %vm57_vm0 = vcmask 130048   ;;  %v499_v4 = vmov 0   ;;  %s625_s0 = inlined_call_operand.vmem [shape: f32[16,8], index: 0, kind: input, shape index: {}]   ;;  %s626_s1 = inlined_call_operand.vmem [shape: f32[32,16], index: 1, kind: input, shape index: {}]   ;;  %s627_s2 = inlined_call_operand.vmem [shape: f32[32,1], index: 2, kind: input, shape index: {}]   ;;  %s628_s3 = inlined_call_operand.vmem [shape: f32[32,32], index: 3, kind: input, shape index: {}]   ;;  %s629_s4 = inlined_call_operand.vmem [shape: f32[32,1], index: 4, kind: input, shape index: {}]   ;;  %s630_s5 = inlined_call_operand.vmem [shape: f32[2,32], index: 5, kind: input, shape index: {}]   ;;  %s631_s6 = inlined_call_operand.vmem [shape: f32[2,1], index: 6, kind: input, shape index: {}]   ;;  %s632_s7 = inlined_call_operand.hbm [shape: f32[2,8], index: 7, kind: output, shape index: {}]  }
   0x1   :  { %v27_v0 = vld [vmem:[%s625_s0] sm:$0xff]  ;;  %v28_v1 = vld [vmem:[%s625_s0 + $0x8] sm:$0xff]  ;;  %473 = vset.pattern.permute.xlu0 %v499_v4  ;;  %474 = vset.pattern.permute.xlu1 %v499_v4  ;;  %v35_v6 = vld [vmem:[%s627_s2 + $0x10] sm:$0xff] }
   0x2   :  { %v29_v2 = vld [vmem:[%s626_s1] sm:$0xff]  ;;  %v450_v3 = vpack.c.bf16 %v28_v1, %v27_v0  ;;  %v30_v7 = vld [vmem:[%s626_s1 + $0x8] sm:$0xff]  ;;  %49 = vperm.xlu1 %474, %v35_v6   ;;  %v31_v9 = vld [vmem:[%s626_s1 + $0x10] sm:$0xff] }
   0x3   :  { %419 = vmatprep.mubr.msk.f32.mxu0 %vm57_vm0, %v29_v2  ;;  %v33_v5 = vld [vmem:[%s627_s2] sm:$0xff]  ;;  %v34_v8 = vld [vmem:[%s627_s2 + $0x8] sm:$0xff]  ;;  %v36_v10 = vld [vmem:[%s627_s2 + $0x18] sm:$0xff] }
   0x4   :  { %451 = vmatprep.subr.bf16.mxu0 %v450_v3  ;;  %39 = vperm.xlu0 %473, %v33_v5  }
   0x5   :  { %453 = vmatpush3.bf16.msra.mxu0 %v450_v3 }
   0x6   :  { %12 = vsyncpa [#allocation3], 0  ;;  %v32_v11 = vld [vmem:[%s626_s1 + $0x18] sm:$0xff]  ;;  %v163_v12 = vld [vmem:[%s629_s4] sm:$0xff]  ;;  %54 = vperm.xlu1 %474, %v36_v10   ;;  %vm187_vm1 = vcmask 261120   ;;  %v500_v39 = vmov 0.0|0.0  }
   0x7   :  { %v164_v13 = vld [vmem:[%s629_s4 + $0x8] sm:$0xff]  ;;  %v165_v14 = vld [vmem:[%s629_s4 + $0x10] sm:$0xff]  ;;  %v166_v15 = vld [vmem:[%s629_s4 + $0x18] sm:$0xff]  ;;  %462 = vmatprep.subr.bf16.mxu0 %v500_v39  ;;  %vm501_vm2 = vmmov 0   ;;  %v502_v40 = vmov 0.0   ;;  %s503_s11 = smov [#allocation2]  }
   0x8   :  { %420 = vmatmul.mubr.msk.f32.vlgmr.msra.gmra.mrb[0].mxu0 %vm57_vm0, %v30_v7  ;;  %44 = vperm.xlu0 %473, %v34_v8   ;;  %v290_v16 = vld [vmem:[%s631_s6] sm:$0x3]  ;;  %v160_v36 = vld [vmem:[%s628_s3 + $0x8] sm:$0xff]  ;;  %v161_v37 = vld [vmem:[%s628_s3 + $0x10] sm:$0xff]  ;;  %s379_s12 = sshll.u32 %s503_s11, 4  ;;  %vm371_vm3 = vcmask 58368   ;;  %s380_s12 = int_to_ptr.vmem [resolvable:$true] %s379_s12 }
   0x9   :  { %422 = vmatprep.mubr.msk.f32.mxu0 %vm57_vm0, %v31_v9  ;;  %v159_v17 = vld [vmem:[%s628_s3] sm:$0xff]  ;;  %v162_v38 = vld [vmem:[%s628_s3 + $0x18] sm:$0xff]  ;;  %s475_s13 = scalar_lea.vmem %s380_s12, 32  ;;  %p480_p1 = scmp.lt.s32.totalorder %s380_s12, %s380_s12 }
   0xa   :  { %174 = vperm.xlu1 %474, %v164_v13   ;;  %433 = vmatprep.mubr.msk.f32.mxu1 %vm187_vm1, %v159_v17  ;;  %v289_v59 = vld [vmem:[%s630_s5] sm:$0x3]  ;;  %p476_p0 = scmp.ne.s32.totalorder %s380_s12, %s475_s13  ;;  %p481_p2 = scmp.lt.s32.totalorder %s475_s13, %s475_s13 }
   0xc   :  { %423 = vmatmul.mubr.msk.f32.gmra.mrb[2].mxu0 %vm57_vm0, %v32_v11  ;;  %169 = vperm.xlu0 %473, %v163_v12   ;;  %p482_p3 = por %p481_p2, %p480_p1 }
   0xd   :  { %447 = vmatprep.mubr.msk.f32.mxu0 %vm501_vm2, %v502_v40 }
   0xe   :  { %184 = vperm.xlu1 %474, %v166_v15   ;;  %p483_p4 = pnand %p482_p3, %p476_p0 }
  0x10   :  { %179 = vperm.xlu0 %473, %v165_v14  }
  0x14   :  { %293 = vperm.xlu0 %473, %v290_v16  }
  0x81   :  { %v50_v19 = vpop.permute.xlu1 %49 }
  0x83   :  { %v40_v18 = vpop.permute.xlu0 %39 }
  0x85   :  { %v55_v26 = vpop.permute.xlu1 %54 }
  0x87   :  { %v45_v20 = vpop.permute.xlu0 %44 }
  0x89   :  { %v175_v41 = vpop.permute.xlu1 %174 }
  0x8b   :  { %v170_v42 = vpop.permute.xlu0 %169 }
  0x8d   :  { %v185_v48 = vpop.permute.xlu1 %184 }
  0x8f   :  { %v180_v51 = vpop.permute.xlu0 %179 }
  0x93   :  { %v294_v60 = vpop.permute.xlu0 %293 }
  0xdb   :  { %v421_v21 = vpop.f32.mrb[0].mxu0 }
  0xdc   :  { %v142_v22 = vadd.f32 %v421_v21, %v45_v20  ;;  %v136_v23 = vpop.f32.mrb[1].mxu0 }
  0xdd   :  { %v137_v24 = vadd.f32 %v136_v23, %v40_v18 }
  0xde   :  { %v156_v25 = vmax.f32 %v142_v22, 0.0 }
  0xdf   :  { %v155_v27 = vmax.f32 %v137_v24, 0.0  ;;  %v424_v28 = vpop.f32.mrb[2].mxu0 }
  0xe0   :  { %v152_v29 = vadd.f32 %v424_v28, %v55_v26  ;;  %v146_v30 = vpop.f32.mrb[3].mxu0 }
  0xe1   :  { %v147_v31 = vadd.f32 %v146_v30, %v50_v19  ;;  %v454_v32 = vpack.c.bf16 %v156_v25, %v155_v27 }
  0xe2   :  { %v158_v33 = vmax.f32 %v152_v29, 0.0 }
  0xe3   :  { %v157_v34 = vmax.f32 %v147_v31, 0.0  ;;  %455 = vmatprep.subr.bf16.mxu1 %v454_v32 }
  0xe4   :  { %457 = vmatpush3.bf16.msra.mxu1 %v454_v32 }
  0xe5   :  { %v458_v35 = vpack.c.bf16 %v158_v33, %v157_v34 }
  0xe7   :  { %459 = vmatprep.subr.bf16.mxu1 %v458_v35 }
  0xe8   :  { %461 = vmatpush3.bf16.msra.mxu1 %v458_v35 }
  0xeb   :  { %434 = vmatmul.mubr.msk.f32.vlgmr.msra.gmra.mrb[0].mxu1 %vm187_vm1, %v160_v36 }
  0xec   :  { %436 = vmatprep.mubr.msk.f32.mxu1 %vm187_vm1, %v161_v37 }
  0xef   :  { %437 = vmatmul.mubr.msk.f32.gmra.mrb[2].mxu1 %vm187_vm1, %v162_v38 }
 0x1be   :  { %v435_v43 = vpop.f32.mrb[0].mxu1 }
 0x1bf   :  { %v272_v44 = vadd.f32 %v435_v43, %v175_v41  ;;  %v266_v45 = vpop.f32.mrb[1].mxu1 }
 0x1c0   :  { %v267_v46 = vadd.f32 %v266_v45, %v170_v42 }
 0x1c1   :  { %v286_v47 = vmax.f32 %v272_v44, 0.0 }
 0x1c2   :  { %v285_v49 = vmax.f32 %v267_v46, 0.0  ;;  %v438_v50 = vpop.f32.mrb[2].mxu1 }
 0x1c3   :  { %v282_v52 = vadd.f32 %v438_v50, %v185_v48  ;;  %v276_v53 = vpop.f32.mrb[3].mxu1 }
 0x1c4   :  { %v463_v54 = vpack.c.bf16 %v286_v47, %v285_v49  ;;  %v277_v55 = vadd.f32 %v276_v53, %v180_v51 }
 0x1c5   :  { %v288_v56 = vmax.f32 %v282_v52, 0.0 }
 0x1c6   :  { %v287_v57 = vmax.f32 %v277_v55, 0.0  ;;  %464 = vmatpush3.bf16.msra.mxu0 %v463_v54 }
 0x1c7   :  { %465 = vmatprep.subr.bf16.mxu0 %v500_v39 }
 0x1c8   :  { %v466_v58 = vpack.c.bf16 %v288_v56, %v287_v57 }
 0x1ca   :  { %467 = vmatpush3.bf16.msra.mxu0 %v466_v58 }
 0x1cd   :  { %448 = vmatmul.mubr.msk.f32.vlgmr.msra.gmra.mrb[4].mxu0 %vm187_vm1, %v289_v59 }
 0x2a0   :  { %v365_v61 = vpop.f32.mrb[4].mxu0 }
 0x2a1   :  { %v366_v62 = vadd.f32 %v365_v61, %v294_v60  ;;  %v449_v63 = vpop.f32.mrb[5].mxu0 }
 0x2a3   :  { %v369_v0 = vmax.f32 %v366_v62, 0.0 }
 0x2a5   :  { %v370_v1 = vadd.f32 0.1, %v369_v0 }
 0x2a7   :  { %372 = vst.msk [vmem:[#allocation2] sm:$0x3] %vm371_vm3, %v370_v1 }
 0x2a8   :  { %486 = shalt.err (!%p483_p4)
}
 0x2a9   :  { %s487_s15 = scalar_lea.hbm %s632_s7, 32 }
 0x2aa   :  { %p488_p5 = scmp.ne.s32.totalorder %s632_s7, %s487_s15  ;;  %p491_p6 = scmp.lt.u32.totalorder %s487_s15, %s632_s7 }
 0x2ac   :  { %p493_p7 = pnand %p491_p6, %p488_p5 }
 0x2ae   :  { %496 = shalt.err (!%p493_p7)
}
 0x2af   :  { %382 = dma.vmem_to_hbm [thread:$0]  %s380_s12, 32, %s632_s7, [#allocation3]  }
 0x2b0   :  { %497 = dma.done.wait [#allocation3], 32  }
 0x2b1   :  { %498 = vsyncadd [#allocation3], 4294967264 }
 0x2b2   :  { %386 = vsyncpa [#allocation3], 1 }

</bundles_post_ra>
